<compile_context>
chip_gen: v6e
topology: v6e:2x2x1
jax: 0.10.0
libtpu: 0.0.40
codegen_flags: <defaults>
</compile_context>

<pallas_src>
import functools

import jax
import jax.numpy as jnp
from jax.experimental import pallas as pl
from jax.experimental.pallas import tpu as pltpu


def _cdiv(a, b):
    return (a + b - 1) // b


def _round_up(n, m):
    return _cdiv(n, m) * m


def _gap_kernel(x_ref, o_ref, acc_ref, *, inv_hw, hw, hw_chunk):
    # x_ref: (TILE_R, HW_CHUNK)   o_ref: (TILE_R, 1)   acc_ref: (TILE_R, 1) f32
    k = pl.program_id(1)

    @pl.when(k == 0)
    def _():
        acc_ref[...] = jnp.zeros_like(acc_ref)

    def _accum(x):
        # Lane-axis sum with f32 accumulation (no full f32 copy of the tile).
        acc_ref[...] += jnp.sum(x, axis=-1, keepdims=True, dtype=jnp.float32)

    rem = hw % hw_chunk
    if rem == 0:
        # Either a single full-HW block or exactly-divisible chunks: no masking.
        _accum(x_ref[...])
    else:
        last = pl.num_programs(1) - 1

        @pl.when(k != last)
        def _():
            _accum(x_ref[...])

        @pl.when(k == last)
        def _():
            # Last H*W chunk is partial: mask out-of-range lanes (no HBM zero-pad).
            lane = jax.lax.broadcasted_iota(jnp.int32, x_ref.shape, 1)
            _accum(jnp.where(lane < rem, x_ref[...], 0))

    @pl.when(k == pl.num_programs(1) - 1)
    def _():
        o_ref[...] = (acc_ref[...] * inv_hw).astype(o_ref.dtype)


def _pick_tile_bytes():
    """Per-input-tile VMEM budget derived from the chip, with a safe fallback."""
    try:
        cap = int(pltpu.get_tpu_info().vmem_capacity_bytes)
    except Exception:
        cap = 64 * 1024 * 1024  # conservative fallback == v7x physical VMEM
    # ~1/8 of physical VMEM per input tile -> 2 double-buffered tiles stay <= 1/4.
    return max(2 * 1024 * 1024, cap // 8), cap


def _choose_tiling(num_rows, hw, itemsize, tile_bytes):
    """Pick (TILE_R, HW_CHUNK) so one lane-padded input tile fits tile_bytes."""
    row_pack = max(8, 32 // itemsize)             # sublane pack: 8 f32 / 16 bf16 / 32 i8
    row_bytes = _round_up(hw, 128) * itemsize     # lane-padded VMEM footprint of one row
    if row_pack * row_bytes <= tile_bytes:
        # One block spans all of H*W (full-dim block -> no 128-divisibility rule).
        tile_r = max(row_pack, (tile_bytes // row_bytes) // row_pack * row_pack)
        if tile_r >= num_rows:
            if num_rows > row_pack:
                # Keep >= 2 row tiles so the "parallel" axis spans both v7x TCs.
                tile_r = _round_up(_cdiv(num_rows, 2), row_pack)
            else:
                tile_r = num_rows  # full array dim -> exempt from sublane multiple
        hw_chunk = hw
    else:
        # Huge spatial extent: chunk H*W in 128-lane multiples, accumulate in f32.
        tile_r = min(row_pack, num_rows)
        hw_chunk = max(128, (tile_bytes // (max(tile_r, 1) * itemsize)) // 128 * 128)
        if hw_chunk >= hw:
            hw_chunk = hw  # single full-dim chunk
    return tile_r, hw_chunk


def global_avg_pool2d(x):
    """Equivalent to F.avg_pool2d(x, kernel_size=x.shape[2:]) for NCHW input."""
    B, C, H, W = x.shape
    R, HW = B * C, H * W
    itemsize = jnp.dtype(x.dtype).itemsize

    tile_bytes, vmem_cap = _pick_tile_bytes()
    tile_r, hw_chunk = _choose_tiling(R, HW, itemsize, tile_bytes)
    grid = (_cdiv(R, tile_r), _cdiv(HW, hw_chunk))

    # Lane-dense 2D view of the contiguous NCHW tensor; no padding, no HBM copy.
    x2 = x.reshape(R, HW)

    kernel = functools.partial(
        _gap_kernel, inv_hw=float(1.0 / HW), hw=HW, hw_chunk=hw_chunk)

    in_tile_bytes = tile_r * _round_up(hw_chunk, 128) * itemsize
    vmem_limit = int(min(vmem_cap * 3 // 4,
                         max(32 * 1024 * 1024, 2 * in_tile_bytes + (8 << 20))))

    out2 = pl.pallas_call(
        kernel,
        out_shape=jax.ShapeDtypeStruct((R, 1), x.dtype),
        grid_spec=pltpu.PrefetchScalarGridSpec(
            num_scalar_prefetch=0,
            grid=grid,
            in_specs=[pl.BlockSpec((tile_r, hw_chunk), lambda i, k: (i, k))],
            out_specs=pl.BlockSpec((tile_r, 1), lambda i, k: (i, 0)),
            scratch_shapes=[pltpu.VMEM((tile_r, 1), jnp.float32)],
        ),
        compiler_params=pltpu.CompilerParams(
            dimension_semantics=("parallel", "arbitrary"),
            vmem_limit_bytes=vmem_limit,
        ),
        cost_estimate=pl.CostEstimate(
            flops=R * HW,
            transcendentals=0,
            bytes_accessed=R * HW * itemsize + R * itemsize,
        ),
    )(x2)

    return out2.reshape(B, C, 1, 1)


if __name__ == "__main__":
    key = jax.random.PRNGKey(0)
    B, C, H, W = 2, 4, 16, 16
    x = jax.random.normal(key, (B, C, H, W), dtype=jnp.float32)

    out = jax.block_until_ready(global_avg_pool2d(x))

    # Reference: F.avg_pool2d(x, x.shape[2:]) == mean over spatial dims.
    ref = jnp.mean(x, axis=(2, 3), keepdims=True)
    assert out.shape == (B, C, 1, 1), out.shape
    assert jnp.allclose(out, ref, atol=1e-5, rtol=1e-5), "mismatch vs reference"

    print("KERNEL_OK")
</pallas_src>

<mosaic_0001>
module attributes {stable_mosaic.version = 11 : i64} {
  func.func @_gap_kernel(%arg0: i32, %arg1: i32, %arg2: memref<8x256xf32, #tpu.memory_space<vmem>>, %arg3: memref<8x1xf32, #tpu.memory_space<vmem>>, %arg4: memref<8x1xf32, #tpu.memory_space<vmem>>) attributes {dimension_semantics = [#tpu.dimension_semantics<parallel>, #tpu.dimension_semantics<arbitrary>], iteration_bounds = array<i64: 1, 1>, scalar_prefetch = 0 : i64, scratch_operands = 1 : i64, tpu.core_type = #tpu.core_type<tc>, window_params = [{transform_indices = @transform_0, window_bounds = array<i64: 8, 256>}, {transform_indices = @transform_1, window_bounds = array<i64: 8, 1>}]} {
    %c0_i32 = arith.constant 0 : i32
    %0 = arith.cmpi eq, %arg1, %c0_i32 : i32
    %1 = arith.extui %0 : i1 to i32
    %c0_i32_0 = arith.constant 0 : i32
    %2 = arith.cmpi ne, %1, %c0_i32_0 : i32
    scf.if %2 {
      %cst_8 = arith.constant 0.000000e+00 : f32
      %12 = vector.broadcast %cst_8 : f32 to vector<8x1xf32>
      %c0_9 = arith.constant 0 : index
      %c0_10 = arith.constant 0 : index
      %13 = vector.load %arg4[%c0_9, %c0_10] : memref<8x1xf32, #tpu.memory_space<vmem>>, vector<8x1xf32>
      tpu.vector_store %arg4[%c0_9, %c0_10], %12 {strides = array<i32>} : memref<8x1xf32, #tpu.memory_space<vmem>>, vector<8x1xf32>,
    } else {
    }
    %c0 = arith.constant 0 : index
    %c0_1 = arith.constant 0 : index
    %3 = vector.load %arg2[%c0, %c0_1] : memref<8x256xf32, #tpu.memory_space<vmem>>, vector<8x256xf32>
    %c0_2 = arith.constant 0 : index
    %c0_3 = arith.constant 0 : index
    %4 = vector.load %arg4[%c0_2, %c0_3] : memref<8x1xf32, #tpu.memory_space<vmem>>, vector<8x1xf32>
    %cst = arith.constant dense<0.000000e+00> : vector<8xf32>
    %5 = vector.multi_reduction <add>, %3, %cst [1] : vector<8x256xf32> to vector<8xf32>
    %6 = vector.shape_cast %5 : vector<8xf32> to vector<8x1xf32>
    %7 = arith.addf %4, %6 : vector<8x1xf32>
    %c0_4 = arith.constant 0 : index
    %c0_5 = arith.constant 0 : index
    %8 = vector.load %arg4[%c0_4, %c0_5] : memref<8x1xf32, #tpu.memory_space<vmem>>, vector<8x1xf32>
    tpu.vector_store %arg4[%c0_4, %c0_5], %7 {strides = array<i32>} : memref<8x1xf32, #tpu.memory_space<vmem>>, vector<8x1xf32>,
    %c0_i32_6 = arith.constant 0 : i32
    %9 = arith.cmpi eq, %arg1, %c0_i32_6 : i32
    %10 = arith.extui %9 : i1 to i32
    %c0_i32_7 = arith.constant 0 : i32
    %11 = arith.cmpi ne, %10, %c0_i32_7 : i32
    scf.if %11 {
      %c0_8 = arith.constant 0 : index
      %c0_9 = arith.constant 0 : index
      %12 = vector.load %arg4[%c0_8, %c0_9] : memref<8x1xf32, #tpu.memory_space<vmem>>, vector<8x1xf32>
      %cst_10 = arith.constant 3.906250e-03 : f32
      %13 = vector.broadcast %cst_10 : f32 to vector<8x1xf32>
      %14 = arith.mulf %12, %13 : vector<8x1xf32>
      %c0_11 = arith.constant 0 : index
      %c0_12 = arith.constant 0 : index
      %15 = vector.load %arg3[%c0_11, %c0_12] : memref<8x1xf32, #tpu.memory_space<vmem>>, vector<8x1xf32>
      tpu.vector_store %arg3[%c0_11, %c0_12], %14 {strides = array<i32>} : memref<8x1xf32, #tpu.memory_space<vmem>>, vector<8x1xf32>,
    } else {
    }
    return
  }
  func.func @transform_0(%arg0: i32, %arg1: i32) -> (i32, i32) {
    %c0_i32 = arith.constant 0 : i32
    return %arg0, %arg1 : i32, i32
  }
  func.func @transform_1(%arg0: i32, %arg1: i32) -> (i32, i32) {
    %c0_i32 = arith.constant 0 : i32
    %c0_i32_0 = arith.constant 0 : i32
    return %arg0, %c0_i32 : i32, i32
  }
}

</mosaic_0001>

<bundles_post_ra>
// kernel: tpu_custom_call.1
= control target key start
LH: loop header
LB: loop body
LE: loop exit
PB: predicated region body
PF: predicated region fallthrough
CT: control target
= control target key end

     0   :  { %6 = vsyncpa [#allocation4], 0  ;;  %s70_s6 = smov [#allocation3]   ;;  %s88_s0 = inlined_call_operand.hbm [shape: f32[8,256], index: 0, kind: input, shape index: {}]   ;;  %s89_s1 = inlined_call_operand.vmem [shape: f32[8,1], index: 1, kind: output, shape index: {}]  }
   0x1   :  { %s13_s7 = sshll.u32 %s70_s6, 4  ;;  %s14_s7 = int_to_ptr.vmem [resolvable:$true] %s13_s7 }
   0x2   :  { %s56_s8 = scalar_lea.vmem %s14_s7, 256  ;;  %p61_p1 = scmp.lt.s32.totalorder %s14_s7, %s14_s7 }
   0x3   :  { %p57_p0 = scmp.ne.s32.totalorder %s14_s7, %s56_s8  ;;  %p62_p2 = scmp.lt.s32.totalorder %s56_s8, %s56_s8 }
   0x5   :  { %p63_p3 = por %p62_p2, %p61_p1 }
   0x7   :  { %p64_p4 = pnand %p63_p3, %p57_p0 }
   0x9   :  { %67 = shalt.err (!%p64_p4)
}
   0xa   :  { %16 = dma.hbm_to_vmem [thread:$0]  %s88_s0, 256, %s14_s7, [#allocation4]  }
   0xb   :  { %68 = dma.done.wait [#allocation4], 256  }
   0xc   :  { %69 = vsyncadd [#allocation4], 4294967040  ;;  %vm24_vm0 = vcmask 7168   ;;  %v71_v0 = vmov 0.0   ;;  %v26_v1 = vld [vmem:[#allocation3] sm:$0xff]  ;;  %v27_v2 = vld [vmem:[#allocation3 + $0x8] sm:$0xff] }
   0xd   :  { %25 = vst.msk [vmem:[#allocation2] sm:$0xff] %vm24_vm0, %v71_v0  ;;  %v29_v3 = vadd.f32 %v27_v2, %v26_v1 }
   0xf   :  { %30 = vadd.xlane.f32.xlu0 %v29_v3 }
  0x14   :  { %v28_v4 = vld [vmem:[#allocation2] sm:$0xff] }
  0x98   :  { %v31_v5 = vpop.xlane.xlu0 %30 }
  0x99   :  { %v32_v6 = vadd.f32 %v31_v5, %v28_v4 }
  0x9b   :  { %34 = vst.msk [vmem:[#allocation2] sm:$0xff] %vm24_vm0, %v32_v6 }
  0xa2   :  { %v38_v7 = vld [vmem:[#allocation2] sm:$0xff] }
  0xa3   :  { %v39_v8 = vmul.f32 0.00390625, %v38_v7 }
  0xa5   :  { %40 = vst.msk [vmem:[%s89_s1] sm:$0xff] %vm24_vm0, %v39_v8 }
  0xa6   :  { %45 = vsyncpa [#allocation4], 1 }

</bundles_post_ra>
